<compile_context>
chip_gen: v7x
topology: tpu7x:2x2x1
jax: 0.10.0
libtpu: 0.0.40
codegen_flags: <defaults>
</compile_context>

<pallas_src>
import functools

import jax
import jax.numpy as jnp
import numpy as np
from jax.experimental import pallas as pl
from jax.experimental.pallas import tpu as pltpu

HIDDEN = 128      # DEFAULT_HIDDEN_UNITS
NEG_INF = -1e30   # softmax mask baked into the packed layer-3 bias


def _policy_over_options_kernel(x_ref, p_ref, out_ref, *, o_pad):
    H = HIDDEN

    x = x_ref[...]                                        # [tb, O_pad]

    # Static, tile-aligned views into the packed parameter slab (256 lanes wide).
    w1 = p_ref[0:o_pad, :]                                # [O_pad, 2H]  (opts | value)
    w2 = p_ref[o_pad:o_pad + H, :]                        # [H, 2H]
    w3 = p_ref[o_pad + H:o_pad + 2 * H, :]                # [H, 2H] (cols [0:K], [H:H+K] real)
    bias = p_ref[o_pad + 2 * H:o_pad + 2 * H + 8, :]      # [8, 2H] (rows 0,1,2 = b1,b2,b3)
    b1 = bias[0:1, :]
    b2 = bias[1:2, :]
    b3 = bias[2:3, :]

    # Layer 1: both heads in one MXU pass -> [tb, 2H].
    h1 = jnp.tanh(jnp.dot(x, w1, preferred_element_type=jnp.float32) + b1)

    # Layer 2: per-head dots (inputs differ); lane slices are 128-aligned.
    h2o = jnp.tanh(
        jnp.dot(h1[:, :H], w2[:, :H], preferred_element_type=jnp.float32) + b2[:, :H]
    )
    h2v = jnp.tanh(
        jnp.dot(h1[:, H:], w2[:, H:], preferred_element_type=jnp.float32) + b2[:, H:]
    )

    # Layer 3: each head produces a full 128-lane block. Padded weight columns are 0 and
    # the options-head bias is -1e30 on padded lanes, so no explicit softmax mask needed.
    logits = jnp.dot(h2o, w3[:, :H], preferred_element_type=jnp.float32) + b3[:, :H]  # [tb, H]
    q = jnp.dot(h2v, w3[:, H:], preferred_element_type=jnp.float32) + b3[:, H:]       # [tb, H]

    # Softmax over the first K lanes (padded lanes underflow exp -> exactly 0).
    m = jnp.max(logits, axis=-1, keepdims=True)
    e = jnp.exp(logits - m)
    s = jnp.sum(e, axis=-1, keepdims=True)
    probs = e * pl.reciprocal(s, approx=True)

    # Lane-dense output slab: two aligned, unmasked 128-lane stores.
    out_ref[:, 0:H] = probs.astype(out_ref.dtype)
    out_ref[:, H:2 * H] = q.astype(out_ref.dtype)


def pack_params(params):
    """Pack all weights/biases of both heads into a single [O_pad+2H+8, 2H] f32 slab."""
    H = HIDDEN
    obs_dim = params["o_w1"].shape[0]
    K = params["o_w3"].shape[1]
    o_pad = ((obs_dim + 7) // 8) * 8

    def pad_to(a, rows, cols, value=0.0):
        return jnp.pad(a, ((0, rows - a.shape[0]), (0, cols - a.shape[1])),
                       constant_values=value)

    # Layer 1: [O_pad, 2H]  (zero rows beyond obs_dim so lane-padding of x is harmless).
    w1 = pad_to(jnp.concatenate([params["o_w1"], params["v_w1"]], axis=1), o_pad, 2 * H)
    # Layer 2: [H, 2H].
    w2 = jnp.concatenate([params["o_w2"], params["v_w2"]], axis=1)
    # Layer 3: [H, 2H]; cols [0:K] = options head, cols [H:H+K] = value head, rest zero.
    w3 = jnp.concatenate(
        [pad_to(params["o_w3"], H, H), pad_to(params["v_w3"], H, H)], axis=1
    )
    # Biases: rows 0/1/2 = b1/b2/b3 (same lane layout as the weights), rows 3..7 zero.
    # The options-head b3 is padded with -1e30 so the softmax mask is free in-kernel.
    b1 = jnp.concatenate([params["o_b1"], params["v_b1"]], axis=1)
    b2 = jnp.concatenate([params["o_b2"], params["v_b2"]], axis=1)
    b3 = jnp.concatenate(
        [pad_to(params["o_b3"], 1, H, value=NEG_INF), pad_to(params["v_b3"], 1, H)], axis=1
    )
    bias = jnp.concatenate([b1, b2, b3, jnp.zeros((5, 2 * H), jnp.float32)], axis=0)

    return jnp.concatenate([w1, w2, w3, bias], axis=0).astype(jnp.float32)


@functools.partial(jax.jit, static_argnames=("num_options",))
def policy_over_options_forward(x, param_slab, *, num_options):
    B, obs_dim = x.shape
    H = HIDDEN
    K = num_options
    o_pad = param_slab.shape[0] - 2 * H - 8

    # Pad x lanes to the slab's W1 row count (zero weight rows make this a no-op math-wise).
    if obs_dim < o_pad:
        x = jnp.pad(x, ((0, 0), (0, o_pad - obs_dim)))

    # Batch tiling: one program for small batches; 256-row tiles on a "parallel" grid
    # (sharded across TensorCores on megacore parts) for large ones.
    tb = 256 if B > 256 else max(8, ((B + 7) // 8) * 8)
    b_pad = ((B + tb - 1) // tb) * tb
    if b_pad != B:
        x = jnp.pad(x, ((0, b_pad - B), (0, 0)))
    nb = b_pad // tb

    kernel = functools.partial(_policy_over_options_kernel, o_pad=o_pad)

    flops = 2 * b_pad * (o_pad * 2 * H + 2 * H * H + 2 * H * H)
    transcendentals = b_pad * (2 * H + 2 * H + H)  # tanh layer1 + tanh layer2 + exp
    bytes_accessed = 4 * (b_pad * o_pad + param_slab.size + b_pad * 2 * H)

    grid_spec = pltpu.PrefetchScalarGridSpec(
        num_scalar_prefetch=0,
        grid=(nb,),
        in_specs=[
            pl.BlockSpec((tb, o_pad), lambda i: (i, 0)),
            pl.BlockSpec(param_slab.shape, lambda i: (0, 0)),  # constant -> DMA'd once
        ],
        out_specs=pl.BlockSpec((tb, 2 * H), lambda i: (i, 0)),
    )

    out = pl.pallas_call(
        kernel,
        out_shape=jax.ShapeDtypeStruct((b_pad, 2 * H), jnp.float32),
        grid_spec=grid_spec,
        compiler_params=pltpu.CompilerParams(dimension_semantics=("parallel",)),
        cost_estimate=pl.CostEstimate(
            flops=flops, transcendentals=transcendentals, bytes_accessed=bytes_accessed
        ),
    )(x, param_slab)

    option_probs = out[:B, :K]
    q_option = out[:B, H:H + K]
    return option_probs, q_option


def make_params(key, obs_dim, num_options):
    """Deterministic synthetic parameters (shapes match the PyTorch module, [in, out])."""
    ks = jax.random.split(key, 12)

    def w(k, shape, scale=0.1):
        return (scale * jax.random.normal(k, shape)).astype(jnp.float32)

    return {
        # net_options: obs_dim -> 128 -> 128 -> num_options (+ softmax)
        "o_w1": w(ks[0], (obs_dim, HIDDEN)), "o_b1": w(ks[1], (1, HIDDEN)),
        "o_w2": w(ks[2], (HIDDEN, HIDDEN)), "o_b2": w(ks[3], (1, HIDDEN)),
        "o_w3": w(ks[4], (HIDDEN, num_options)), "o_b3": w(ks[5], (1, num_options)),
        # value_net: obs_dim -> 128 -> 128 -> num_options
        "v_w1": w(ks[6], (obs_dim, HIDDEN)), "v_b1": w(ks[7], (1, HIDDEN)),
        "v_w2": w(ks[8], (HIDDEN, HIDDEN)), "v_b2": w(ks[9], (1, HIDDEN)),
        "v_w3": w(ks[10], (HIDDEN, num_options)), "v_b3": w(ks[11], (1, num_options)),
    }


def _reference_forward(x, p):
    """Pure-JAX reference of the PyTorch forward."""
    h = jnp.tanh(x @ p["o_w1"] + p["o_b1"])
    h = jnp.tanh(h @ p["o_w2"] + p["o_b2"])
    option_probs = jax.nn.softmax(h @ p["o_w3"] + p["o_b3"], axis=-1)
    g = jnp.tanh(x @ p["v_w1"] + p["v_b1"])
    g = jnp.tanh(g @ p["v_w2"] + p["v_b2"])
    q_option = g @ p["v_w3"] + p["v_b3"]
    return option_probs, q_option


if __name__ == "__main__":
    key = jax.random.PRNGKey(0)
    k_params, k_x = jax.random.split(key)

    B, OBS_DIM, NUM_OPTIONS = 8, 32, 8
    params = make_params(k_params, OBS_DIM, NUM_OPTIONS)
    x = jax.random.normal(k_x, (B, OBS_DIM), jnp.float32)

    param_slab = jax.block_until_ready(pack_params(params))

    option_probs, q_option = jax.block_until_ready(
        policy_over_options_forward(x, param_slab, num_options=NUM_OPTIONS)
    )

    ref_probs, ref_q = _reference_forward(x, params)
    assert option_probs.shape == (B, NUM_OPTIONS)
    assert q_option.shape == (B, NUM_OPTIONS)
    np.testing.assert_allclose(np.asarray(option_probs), np.asarray(ref_probs),
                               rtol=5e-2, atol=5e-3)
    np.testing.assert_allclose(np.asarray(q_option), np.asarray(ref_q),
                               rtol=5e-2, atol=5e-3)
    np.testing.assert_allclose(np.asarray(option_probs).sum(axis=-1),
                               np.ones(B, np.float32), atol=5e-3)

    print("KERNEL_OK")
</pallas_src>

<mosaic_0001>
module attributes {stable_mosaic.version = 11 : i64} {
  func.func @_policy_over_options_kernel(%arg0: i32, %arg1: memref<8x32xf32, #tpu.memory_space<vmem>>, %arg2: memref<296x256xf32, #tpu.memory_space<vmem>>, %arg3: memref<8x256xf32, #tpu.memory_space<vmem>>) attributes {dimension_semantics = [#tpu.dimension_semantics<parallel>], iteration_bounds = array<i64: 1>, scalar_prefetch = 0 : i64, scratch_operands = 0 : i64, tpu.core_type = #tpu.core_type<tc>, window_params = [{transform_indices = @transform_0, window_bounds = array<i64: 8, 32>}, {pipeline_mode = #tpu.pipeline_mode<synchronous>, transform_indices = @transform_1, window_bounds = array<i64: 296, 256>}, {transform_indices = @transform_2, window_bounds = array<i64: 8, 256>}]} {
    %c0 = arith.constant 0 : index
    %c0_0 = arith.constant 0 : index
    %0 = vector.load %arg1[%c0, %c0_0] : memref<8x32xf32, #tpu.memory_space<vmem>>, vector<8x32xf32>
    %c0_1 = arith.constant 0 : index
    %c0_2 = arith.constant 0 : index
    %1 = vector.load %arg2[%c0_1, %c0_2] : memref<296x256xf32, #tpu.memory_space<vmem>>, vector<32x256xf32>
    %c32 = arith.constant 32 : index
    %c0_3 = arith.constant 0 : index
    %2 = vector.load %arg2[%c32, %c0_3] : memref<296x256xf32, #tpu.memory_space<vmem>>, vector<128x256xf32>
    %c160 = arith.constant 160 : index
    %c0_4 = arith.constant 0 : index
    %3 = vector.load %arg2[%c160, %c0_4] : memref<296x256xf32, #tpu.memory_space<vmem>>, vector<128x256xf32>
    %c288 = arith.constant 288 : index
    %c0_5 = arith.constant 0 : index
    %4 = vector.load %arg2[%c288, %c0_5] : memref<296x256xf32, #tpu.memory_space<vmem>>, vector<8x256xf32>
    %5 = vector.extract_strided_slice %4 {offsets = [0, 0], sizes = [1, 256], strides = [1, 1]} : vector<8x256xf32> to vector<1x256xf32>
    %6 = vector.extract_strided_slice %4 {offsets = [1, 0], sizes = [1, 256], strides = [1, 1]} : vector<8x256xf32> to vector<1x256xf32>
    %7 = vector.extract_strided_slice %4 {offsets = [2, 0], sizes = [1, 256], strides = [1, 1]} : vector<8x256xf32> to vector<1x256xf32>
    %cst = arith.constant dense<0.000000e+00> : vector<8x256xf32>
    %8 = tpu.matmul %0, %1, %cst {dimension_numbers = #tpu.dot_dimension_numbers<[1], [0], [0], [1], [0, 0, 1, 1], [], []>} : vector<8x32xf32>, vector<32x256xf32>, vector<8x256xf32> -> vector<8x256xf32>
    %9 = vector.broadcast %5 : vector<1x256xf32> to vector<8x256xf32>
    %10 = arith.addf %8, %9 : vector<8x256xf32>
    %11 = math.tanh %10 : vector<8x256xf32>
    %12 = vector.extract_strided_slice %11 {offsets = [0, 0], sizes = [8, 128], strides = [1, 1]} : vector<8x256xf32> to vector<8x128xf32>
    %13 = vector.extract_strided_slice %2 {offsets = [0, 0], sizes = [128, 128], strides = [1, 1]} : vector<128x256xf32> to vector<128x128xf32>
    %cst_6 = arith.constant dense<0.000000e+00> : vector<8x128xf32>
    %14 = tpu.matmul %12, %13, %cst_6 {dimension_numbers = #tpu.dot_dimension_numbers<[1], [0], [0], [1], [0, 0, 1, 1], [], []>} : vector<8x128xf32>, vector<128x128xf32>, vector<8x128xf32> -> vector<8x128xf32>
    %15 = vector.extract_strided_slice %6 {offsets = [0, 0], sizes = [1, 128], strides = [1, 1]} : vector<1x256xf32> to vector<1x128xf32>
    %16 = vector.broadcast %15 : vector<1x128xf32> to vector<8x128xf32>
    %17 = arith.addf %14, %16 : vector<8x128xf32>
    %18 = math.tanh %17 : vector<8x128xf32>
    %19 = vector.extract_strided_slice %11 {offsets = [0, 128], sizes = [8, 128], strides = [1, 1]} : vector<8x256xf32> to vector<8x128xf32>
    %20 = vector.extract_strided_slice %2 {offsets = [0, 128], sizes = [128, 128], strides = [1, 1]} : vector<128x256xf32> to vector<128x128xf32>
    %cst_7 = arith.constant dense<0.000000e+00> : vector<8x128xf32>
    %21 = tpu.matmul %19, %20, %cst_7 {dimension_numbers = #tpu.dot_dimension_numbers<[1], [0], [0], [1], [0, 0, 1, 1], [], []>} : vector<8x128xf32>, vector<128x128xf32>, vector<8x128xf32> -> vector<8x128xf32>
    %22 = vector.extract_strided_slice %6 {offsets = [0, 128], sizes = [1, 128], strides = [1, 1]} : vector<1x256xf32> to vector<1x128xf32>
    %23 = vector.broadcast %22 : vector<1x128xf32> to vector<8x128xf32>
    %24 = arith.addf %21, %23 : vector<8x128xf32>
    %25 = math.tanh %24 : vector<8x128xf32>
    %26 = vector.extract_strided_slice %3 {offsets = [0, 0], sizes = [128, 128], strides = [1, 1]} : vector<128x256xf32> to vector<128x128xf32>
    %cst_8 = arith.constant dense<0.000000e+00> : vector<8x128xf32>
    %27 = tpu.matmul %18, %26, %cst_8 {dimension_numbers = #tpu.dot_dimension_numbers<[1], [0], [0], [1], [0, 0, 1, 1], [], []>} : vector<8x128xf32>, vector<128x128xf32>, vector<8x128xf32> -> vector<8x128xf32>
    %28 = vector.extract_strided_slice %7 {offsets = [0, 0], sizes = [1, 128], strides = [1, 1]} : vector<1x256xf32> to vector<1x128xf32>
    %29 = vector.broadcast %28 : vector<1x128xf32> to vector<8x128xf32>
    %30 = arith.addf %27, %29 : vector<8x128xf32>
    %31 = vector.extract_strided_slice %3 {offsets = [0, 128], sizes = [128, 128], strides = [1, 1]} : vector<128x256xf32> to vector<128x128xf32>
    %cst_9 = arith.constant dense<0.000000e+00> : vector<8x128xf32>
    %32 = tpu.matmul %25, %31, %cst_9 {dimension_numbers = #tpu.dot_dimension_numbers<[1], [0], [0], [1], [0, 0, 1, 1], [], []>} : vector<8x128xf32>, vector<128x128xf32>, vector<8x128xf32> -> vector<8x128xf32>
    %33 = vector.extract_strided_slice %7 {offsets = [0, 128], sizes = [1, 128], strides = [1, 1]} : vector<1x256xf32> to vector<1x128xf32>
    %34 = vector.broadcast %33 : vector<1x128xf32> to vector<8x128xf32>
    %35 = arith.addf %32, %34 : vector<8x128xf32>
    %cst_10 = arith.constant dense<0xFF800000> : vector<8xf32>
    %36 = vector.multi_reduction <maximumf>, %30, %cst_10 [1] : vector<8x128xf32> to vector<8xf32>
    %37 = vector.shape_cast %36 : vector<8xf32> to vector<8x1xf32>
    %38 = vector.broadcast %37 : vector<8x1xf32> to vector<8x128xf32>
    %39 = arith.subf %30, %38 : vector<8x128xf32>
    %40 = math.exp %39 : vector<8x128xf32>
    %cst_11 = arith.constant dense<0.000000e+00> : vector<8xf32>
    %41 = vector.multi_reduction <add>, %40, %cst_11 [1] : vector<8x128xf32> to vector<8xf32>
    %42 = vector.shape_cast %41 : vector<8xf32> to vector<8x1xf32>
    %43 = tpu.reciprocal %42 {approx = true} : vector<8x1xf32> -> vector<8x1xf32>
    %44 = vector.broadcast %43 : vector<8x1xf32> to vector<8x128xf32>
    %45 = arith.mulf %40, %44 : vector<8x128xf32>
    %c0_12 = arith.constant 0 : index
    %c0_13 = arith.constant 0 : index
    %46 = vector.load %arg3[%c0_12, %c0_13] : memref<8x256xf32, #tpu.memory_space<vmem>>, vector<8x128xf32>
    tpu.vector_store %arg3[%c0_12, %c0_13], %45 {strides = array<i32>} : memref<8x256xf32, #tpu.memory_space<vmem>>, vector<8x128xf32>,
    %c0_14 = arith.constant 0 : index
    %c128 = arith.constant 128 : index
    %47 = vector.load %arg3[%c0_14, %c128] : memref<8x256xf32, #tpu.memory_space<vmem>>, vector<8x128xf32>
    tpu.vector_store %arg3[%c0_14, %c128], %35 {strides = array<i32>} : memref<8x256xf32, #tpu.memory_space<vmem>>, vector<8x128xf32>,
    return
  }
  func.func @transform_0(%arg0: i32) -> (i32, i32) {
    %c0_i32 = arith.constant 0 : i32
    %c0_i32_0 = arith.constant 0 : i32
    return %arg0, %c0_i32 : i32, i32
  }
  func.func @transform_1(%arg0: i32) -> (i32, i32) {
    %c0_i32 = arith.constant 0 : i32
    %c0_i32_0 = arith.constant 0 : i32
    %c0_i32_1 = arith.constant 0 : i32
    return %c0_i32, %c0_i32_0 : i32, i32
  }
  func.func @transform_2(%arg0: i32) -> (i32, i32) {
    %c0_i32 = arith.constant 0 : i32
    %c0_i32_0 = arith.constant 0 : i32
    return %arg0, %c0_i32 : i32, i32
  }
}

</mosaic_0001>

<bundles_post_ra>
// kernel: policy_over_options_forward.1
= control target key start
LH: loop header
LB: loop body
LE: loop exit
PB: predicated region body
PF: predicated region fallthrough
CT: control target
= control target key end

     0   :  { %7 = vsyncpa [#allocation3], 0  ;;  %s1007_s0 = inlined_call_operand.hbm [shape: f32[8,32], index: 0, kind: input, shape index: {}]   ;;  %s1008_s1 = inlined_call_operand.hbm [shape: f32[296,256], index: 1, kind: input, shape index: {}]   ;;  %s1009_s2 = inlined_call_operand.vmem [shape: f32[8,256], index: 2, kind: output, shape index: {}]  }
   0x1   :  { %8 = vsyncpa [#allocation5], 0  ;;  %s892_s9 = smov [#allocation2]   ;;  %s893_s11 = smov [#allocation4]  }
   0x2   :  { %s15_s10 = sshll.u32 %s892_s9, 4  ;;  %s24_s12 = sshll.u32 %s893_s11, 4  ;;  %s16_s10 = int_to_ptr.vmem [resolvable:$true] %s15_s10  ;;  %s914_s12 = int_to_ptr.vmem [resolvable:$true] %s24_s12 }
   0x3   :  { %s844_s15 = scalar_lea.hbm %s1007_s0, 128 }
   0x4   :  { %p845_p0 = scmp.ne.s32.totalorder %s1007_s0, %s844_s15  ;;  %p848_p1 = scmp.lt.u32.totalorder %s844_s15, %s1007_s0 }
   0x6   :  { %p850_p2 = pnand %p848_p1, %p845_p0 }
   0x8   :  { %853 = shalt.err (!%p850_p2)
}
   0x9   :  { %s854_s20 = scalar_lea.vmem %s16_s10, 128  ;;  %p859_p4 = scmp.lt.s32.totalorder %s16_s10, %s16_s10 }
   0xa   :  { %p855_p3 = scmp.ne.s32.totalorder %s16_s10, %s854_s20  ;;  %p860_p5 = scmp.lt.s32.totalorder %s854_s20, %s854_s20 }
   0xc   :  { %p861_p6 = por %p860_p5, %p859_p4 }
   0xe   :  { %p862_p7 = pnand %p861_p6, %p855_p3 }
  0x10   :  { %865 = shalt.err (!%p862_p7)
}
  0x11   :  { %18 = dma.hbm_to_vmem [thread:$0]  %s1007_s0, 128, %s16_s10, [#allocation3]  }
  0x12   :  { %s866_s25 = scalar_lea.hbm %s1008_s1, 9472 }
  0x13   :  { %p867_p8 = scmp.ne.s32.totalorder %s1008_s1, %s866_s25  ;;  %p870_p9 = scmp.lt.u32.totalorder %s866_s25, %s1008_s1 }
  0x15   :  { %p872_p10 = pnand %p870_p9, %p867_p8 }
  0x17   :  { %875 = shalt.err (!%p872_p10)
}
  0x18   :  { %s876_s30 = scalar_lea.vmem %s914_s12, 9472  ;;  %p881_p12 = scmp.lt.s32.totalorder %s914_s12, %s914_s12 }
  0x19   :  { %p877_p11 = scmp.ne.s32.totalorder %s914_s12, %s876_s30  ;;  %p882_p13 = scmp.lt.s32.totalorder %s876_s30, %s876_s30 }
  0x1b   :  { %p883_p0 = por %p882_p13, %p881_p12 }
  0x1d   :  { %p884_p1 = pnand %p883_p0, %p877_p11 }
  0x1f   :  { %887 = shalt.err (!%p884_p1)
}
  0x20   :  { %s894_s0 = smov 256   ;;  %s895_s3 = smov 16  }
  0x21   :  { %30 = dma.hbm_to_vmem [thread:$0]  %s1008_s1, 9472, %s914_s12, [#allocation5], %s894_s0, %s894_s0, %s895_s3  }
  0x22   :  { %888 = dma.done.wait [#allocation3], 128  }
  0x23   :  { %889 = vsyncadd [#allocation3], 4294967168 }
  0x24   :  { %890 = dma.done.wait [#allocation5], 9472  }
  0x25   :  { %891 = vsyncadd [#allocation5], 4294957824  ;;  %v896_v0 = vmov 0.0   ;;  %v897_v1 = vmov 0.0|0.0   ;;  %v39_v2 = vld [vmem:[#allocation4 + $0x8] sm:$0xff]  ;;  %v41_v3 = vld [vmem:[#allocation4 + $0x18] sm:$0xff]  ;;  %v112_v63 = vlaneseq }
  0x26   :  { %188 = vmatprep.mubr.f32.mxu0 %v896_v0  ;;  %729 = vmatprep.subr.bf16.mxu1 %v897_v1  ;;  %v38_v4 = vld [vmem:[#allocation4] sm:$0xff]  ;;  %v721_v5 = vpack.c.bf16 %v41_v3, %v39_v2  ;;  %v40_v6 = vld [vmem:[#allocation4 + $0x10] sm:$0xff]  ;;  %v43_v7 = vld [vmem:[#allocation4 + $0x28] sm:$0xff]  ;;  %vm120_vm0 = vcmask 261120   ;;  %vm898_vm1 = vmmov 0  }
  0x27   :  { %v45_v8 = vld [vmem:[#allocation4 + $0x38] sm:$0xff]  ;;  %v723_v9 = vpack.c.bf16 %v40_v6, %v38_v4  ;;  %v42_v11 = vld [vmem:[#allocation4 + $0x20] sm:$0xff]  ;;  %v44_v12 = vld [vmem:[#allocation4 + $0x30] sm:$0xff]  ;;  %613 = vmatprep.mubr.msk.f32.mxu1 %vm898_vm1, %v896_v0  ;;  %v968_v2 = vshrl.u32 %v112_v63, 7 }
  0x28   :  { %v725_v10 = vpack.c.bf16 %v45_v8, %v43_v7  ;;  %722 = vmatprep.subr.bf16.mxu0 %v721_v5  ;;  %v46_v13 = vld [vmem:[#allocation4 + $0x40] sm:$0xff]  ;;  %v48_v14 = vld [vmem:[#allocation4 + $0x50] sm:$0xff]  ;;  %v727_v15 = vpack.c.bf16 %v44_v12, %v42_v11  ;;  %v47_v19 = vld [vmem:[#allocation4 + $0x48] sm:$0xff] }
  0x29   :  { %724 = vmatpush1.bf16.msra.mxu0 %v723_v9  ;;  %v730_v16 = vpack.c.bf16 %v48_v14, %v46_v13  ;;  %v50_v17 = vld [vmem:[#allocation4 + $0x60] sm:$0xff]  ;;  %v52_v18 = vld [vmem:[#allocation4 + $0x70] sm:$0xff]  ;;  %v49_v20 = vld [vmem:[#allocation4 + $0x58] sm:$0xff]  ;;  %v114_v3 = vsub.s32 0, %v968_v2 }
  0x2a   :  { %726 = vmatprep.subr.bf16.mxu0 %v725_v10  ;;  %v733_v21 = vpack.c.bf16 %v52_v18, %v50_v17  ;;  %v54_v22 = vld [vmem:[#allocation4 + $0x80] sm:$0xff]  ;;  %v56_v23 = vld [vmem:[#allocation4 + $0x90] sm:$0xff]  ;;  %v37_v24 = vld [vmem:[#allocation2] sm:$0xff]  ;;  %v754_v25 = vpack.c.bf16 %v49_v20, %v47_v19 }
  0x2b   :  { %731 = vmatpush3.bf16.msra.mxu1 %v730_v16  ;;  %v51_v26 = vld [vmem:[#allocation4 + $0x68] sm:$0xff]  ;;  %v53_v27 = vld [vmem:[#allocation4 + $0x78] sm:$0xff]  ;;  %v736_v28 = vpack.c.bf16 %v56_v23, %v54_v22  ;;  %v58_v29 = vld [vmem:[#allocation4 + $0xa0] sm:$0xff] }
  0x2c   :  { %732 = vmatprep.subr.bf16.mxu1 %v897_v1  ;;  %v60_v30 = vld [vmem:[#allocation4 + $0xb0] sm:$0xff]  ;;  %v757_v31 = vpack.c.bf16 %v53_v27, %v51_v26  ;;  %v55_v32 = vld [vmem:[#allocation4 + $0x88] sm:$0xff]  ;;  %v57_v33 = vld [vmem:[#allocation4 + $0x98] sm:$0xff] }
  0x2d   :  { %728 = vmatpush1.bf16.msra.mxu0 %v727_v15  ;;  %v739_v34 = vpack.c.bf16 %v60_v30, %v58_v29  ;;  %v62_v35 = vld [vmem:[#allocation4 + $0xc0] sm:$0xff]  ;;  %v64_v36 = vld [vmem:[#allocation4 + $0xd0] sm:$0xff]  ;;  %v760_v37 = vpack.c.bf16 %v57_v33, %v55_v32  ;;  %v59_v38 = vld [vmem:[#allocation4 + $0xa8] sm:$0xff] }
  0x2e   :  { %753 = vmatprep.subr.bf16.mxu0 %v897_v1  ;;  %v61_v39 = vld [vmem:[#allocation4 + $0xb8] sm:$0xff]  ;;  %v742_v40 = vpack.c.bf16 %v64_v36, %v62_v35  ;;  %v63_v42 = vld [vmem:[#allocation4 + $0xc8] sm:$0xff]  ;;  %v66_v45 = vld [vmem:[#allocation4 + $0xe0] sm:$0xff] }
  0x2f   :  { %734 = vmatpush3.bf16.msra.mxu1 %v733_v21  ;;  %v763_v41 = vpack.c.bf16 %v61_v39, %v59_v38  ;;  %v65_v43 = vld [vmem:[#allocation4 + $0xd8] sm:$0xff]  ;;  %v68_v46 = vld [vmem:[#allocation4 + $0xf0] sm:$0xff]  ;;  %v67_v48 = vld [vmem:[#allocation4 + $0xe8] sm:$0xff] }
  0x30   :  { %512 = vmatmul.mubr.msk.f32.vlgmr.msra.gmra.mrb[0].mxu0 %vm120_vm0, %v37_v24  ;;  %735 = vmatprep.subr.bf16.mxu1 %v897_v1  ;;  %v766_v44 = vpack.c.bf16 %v65_v43, %v63_v42  ;;  %v745_v47 = vpack.c.bf16 %v68_v46, %v66_v45  ;;  %v69_v49 = vld [vmem:[#allocation4 + $0xf8] sm:$0xff]  ;;  %v70_v51 = vld [vmem:[#allocation4 + $0x100] sm:$0xff]  ;;  %v72_v52 = vld [vmem:[#allocation4 + $0x110] sm:$0xff] }
  0x31   :  { %755 = vmatpush3.bf16.msra.mxu0 %v754_v25  ;;  %v769_v50 = vpack.c.bf16 %v69_v49, %v67_v48  ;;  %v71_v53 = vld [vmem:[#allocation4 + $0x108] sm:$0xff]  ;;  %v748_v54 = vpack.c.bf16 %v72_v52, %v70_v51  ;;  %v73_v55 = vld [vmem:[#allocation4 + $0x118] sm:$0xff]  ;;  %v74_v56 = vld [vmem:[#allocation4 + $0x120] sm:$0xff]  ;;  %648 = vmatprep.mubr.msk.f32.mxu0 %vm898_vm1, %v896_v0 }
  0x32   :  { %756 = vmatprep.subr.bf16.mxu0 %v897_v1  ;;  %v76_v57 = vld [vmem:[#allocation4 + $0x130] sm:$0xff]  ;;  %v772_v58 = vpack.c.bf16 %v73_v55, %v71_v53  ;;  %v75_v59 = vld [vmem:[#allocation4 + $0x128] sm:$0xff]  ;;  %v77_v60 = vld [vmem:[#allocation4 + $0x138] sm:$0xff] }
  0x33   :  { %737 = vmatpush3.bf16.msra.mxu1 %v736_v28  ;;  %v751_v61 = vpack.c.bf16 %v76_v57, %v74_v56  ;;  %v775_v62 = vpack.c.bf16 %v77_v60, %v75_v59  ;;  %v971_v4 = vld [vmem:[#allocation4 + $0x240] sm:$0xff]  ;;  %v973_v5 = vld [vmem:[#allocation4 + $0x248] sm:$0xff]  ;;  %v80_v13 = vld [vmem:[#allocation4 + $0x150] sm:$0xff] }
  0x34   :  { %738 = vmatprep.subr.bf16.mxu1 %v897_v1  ;;  %v115_v6 = vrot.slane %v971_v4, %v114_v3  ;;  %v119_v7 = vrot.slane %v973_v5, %v114_v3  ;;  %v78_v12 = vld [vmem:[#allocation4 + $0x140] sm:$0xff]  ;;  %v79_v14 = vld [vmem:[#allocation4 + $0x148] sm:$0xff]  ;;  %v81_v15 = vld [vmem:[#allocation4 + $0x158] sm:$0xff] }
  0x35   :  { %758 = vmatpush3.bf16.msra.mxu0 %v757_v31  ;;  %v778_v16 = vpack.c.bf16 %v80_v13, %v78_v12  ;;  %v802_v17 = vpack.c.bf16 %v81_v15, %v79_v14  ;;  %v82_v18 = vld [vmem:[#allocation4 + $0x160] sm:$0xff]  ;;  %v84_v19 = vld [vmem:[#allocation4 + $0x170] sm:$0xff]  ;;  %v83_v21 = vld [vmem:[#allocation4 + $0x168] sm:$0xff] }
  0x36   :  { %759 = vmatprep.subr.bf16.mxu0 %v897_v1  ;;  %v85_v22 = vld [vmem:[#allocation4 + $0x178] sm:$0xff]  ;;  %v781_v24 = vpack.c.bf16 %v84_v19, %v82_v18  ;;  %v86_v26 = vld [vmem:[#allocation4 + $0x180] sm:$0xff]  ;;  %v88_v27 = vld [vmem:[#allocation4 + $0x190] sm:$0xff] }
  0x37   :  { %740 = vmatpush3.bf16.msra.mxu1 %v739_v34  ;;  %v805_v25 = vpack.c.bf16 %v85_v22, %v83_v21  ;;  %v87_v28 = vld [vmem:[#allocation4 + $0x188] sm:$0xff]  ;;  %v89_v29 = vld [vmem:[#allocation4 + $0x198] sm:$0xff]  ;;  %v784_v30 = vpack.c.bf16 %v88_v27, %v86_v26  ;;  %v90_v32 = vld [vmem:[#allocation4 + $0x1a0] sm:$0xff] }
  0x38   :  { %741 = vmatprep.subr.bf16.mxu1 %v897_v1  ;;  %v808_v31 = vpack.c.bf16 %v89_v29, %v87_v28  ;;  %v92_v33 = vld [vmem:[#allocation4 + $0x1b0] sm:$0xff]  ;;  %v91_v34 = vld [vmem:[#allocation4 + $0x1a8] sm:$0xff]  ;;  %v93_v35 = vld [vmem:[#allocation4 + $0x1b8] sm:$0xff] }
  0x39   :  { %761 = vmatpush3.bf16.msra.mxu0 %v760_v37  ;;  %v787_v36 = vpack.c.bf16 %v92_v33, %v90_v32  ;;  %v811_v37 = vpack.c.bf16 %v93_v35, %v91_v34  ;;  %v94_v38 = vld [vmem:[#allocation4 + $0x1c0] sm:$0xff]  ;;  %v99_v46 = vld [vmem:[#allocation4 + $0x1e8] sm:$0xff]  ;;  %v105_v53 = vld [vmem:[#allocation4 + $0x218] sm:$0xff] }
  0x3a   :  { %762 = vmatprep.subr.bf16.mxu0 %v897_v1  ;;  %v98_v43 = vld [vmem:[#allocation4 + $0x1e0] sm:$0xff]  ;;  %v103_v51 = vld [vmem:[#allocation4 + $0x208] sm:$0xff]  ;;  %v108_v55 = vld [vmem:[#allocation4 + $0x230] sm:$0xff] }
  0x3b   :  { %743 = vmatpush3.bf16.msra.mxu1 %v742_v40  ;;  %v95_v40 = vld [vmem:[#allocation4 + $0x1c8] sm:$0xff]  ;;  %v102_v49 = vld [vmem:[#allocation4 + $0x200] sm:$0xff]  ;;  %v820_v56 = vpack.c.bf16 %v105_v53, %v103_v51 }
  0x3c   :  { %744 = vmatprep.subr.bf16.mxu1 %v897_v1  ;;  %v107_v57 = vld [vmem:[#allocation4 + $0x228] sm:$0xff] }
  0x3d   :  { %764 = vmatpush3.bf16.msra.mxu0 %v763_v41  ;;  %v97_v41 = vld [vmem:[#allocation4 + $0x1d8] sm:$0xff] }
  0x3e   :  { %765 = vmatprep.subr.bf16.mxu0 %v897_v1  ;;  %v814_v42 = vpack.c.bf16 %v97_v41, %v95_v40 }
  0x3f   :  { %746 = vmatpush3.bf16.msra.mxu1 %v745_v47  ;;  %v101_v47 = vld [vmem:[#allocation4 + $0x1f8] sm:$0xff] }
  0x40   :  { %747 = vmatprep.subr.bf16.mxu1 %v897_v1  ;;  %v817_v48 = vpack.c.bf16 %v101_v47, %v99_v46 }
  0x41   :  { %767 = vmatpush3.bf16.msra.mxu0 %v766_v44  ;;  %v100_v44 = vld [vmem:[#allocation4 + $0x1f0] sm:$0xff] }
  0x42   :  { %768 = vmatprep.subr.bf16.mxu0 %v897_v1  ;;  %v793_v45 = vpack.c.bf16 %v100_v44, %v98_v43 }
  0x43   :  { %749 = vmatpush3.bf16.msra.mxu1 %v748_v54  ;;  %v106_v54 = vld [vmem:[#allocation4 + $0x220] sm:$0xff] }
  0x44   :  { %750 = vmatprep.subr.bf16.mxu1 %v897_v1  ;;  %v799_v59 = vpack.c.bf16 %v108_v55, %v106_v54 }
  0x45   :  { %770 = vmatpush3.bf16.msra.mxu0 %v769_v50  ;;  %v104_v50 = vld [vmem:[#allocation4 + $0x210] sm:$0xff] }
  0x46   :  { %771 = vmatprep.subr.bf16.mxu0 %v897_v1  ;;  %v796_v52 = vpack.c.bf16 %v104_v50, %v102_v49 }
  0x47   :  { %752 = vmatpush3.bf16.msra.mxu1 %v751_v61  ;;  %v199_v61 = vsub.s32 1, %v968_v2 }
  0x48   :  { %777 = vmatprep.subr.bf16.mxu1 %v897_v1 }
  0x49   :  { %773 = vmatpush3.bf16.msra.mxu0 %v772_v58  ;;  %v109_v58 = vld [vmem:[#allocation4 + $0x238] sm:$0xff]  ;;  %v275_v63 = vrot.slane %v973_v5, %v199_v61 }
  0x4a   :  { %774 = vmatprep.subr.bf16.mxu0 %v897_v1  ;;  %v823_v60 = vpack.c.bf16 %v109_v58, %v107_v57 }
  0x4d   :  { %776 = vmatpush3.bf16.msra.mxu0 %v775_v62  ;;  %v200_v62 = vrot.slane %v971_v4, %v199_v61 }
  0x4e   :  { %801 = vmatprep.subr.bf16.mxu0 %v897_v1 }
 0x103   :  { %v190_v8 = vpop.f32.mrb[0].mxu0 }
 0x104   :  { %v191_v9 = vadd.f32 %v190_v8, %v115_v6  ;;  %v192_v10 = vpop.f32.mrb[1].mxu0 }
 0x105   :  { %v193_v11 = vadd.f32 %v192_v10, %v119_v7 }
 0x106   :  { %832 = vtanh.f32 %v191_v9 }
 0x107   :  { %834 = vtanh.f32 %v193_v11 }
 0x110   :  { %v833_v20 = vpop.eup %832 }
 0x111   :  { %v835_v23 = vpop.eup %834  ;;  %614 = vmatmul.mubr.f32.vlgmr.msra.gmra.mrb[0].mxu1 %v833_v20 }
 0x112   :  { %649 = vmatmul.mubr.f32.vlgmr.msra.gmra.mrb[2].mxu0 %v835_v23  ;;  %779 = vmatpush3.bf16.msra.mxu1 %v778_v16 }
 0x113   :  { %803 = vmatpush3.bf16.msra.mxu0 %v802_v17  ;;  %780 = vmatprep.subr.bf16.mxu1 %v897_v1 }
 0x114   :  { %804 = vmatprep.subr.bf16.mxu0 %v897_v1  ;;  %683 = vmatprep.mubr.msk.f32.mxu1 %vm898_vm1, %v896_v0 }
 0x115   :  { %718 = vmatprep.mubr.msk.f32.mxu0 %vm898_vm1, %v896_v0  ;;  %v96_v0 = vld [vmem:[#allocation4 + $0x1d0] sm:$0xff] }
 0x116   :  { %782 = vmatpush3.bf16.msra.mxu1 %v781_v24  ;;  %v790_v39 = vpack.c.bf16 %v96_v0, %v94_v38 }
 0x117   :  { %806 = vmatpush3.bf16.msra.mxu0 %v805_v25  ;;  %783 = vmatprep.subr.bf16.mxu1 %v897_v1 }
 0x118   :  { %807 = vmatprep.subr.bf16.mxu0 %v897_v1 }
 0x11a   :  { %785 = vmatpush3.bf16.msra.mxu1 %v784_v30 }
 0x11b   :  { %809 = vmatpush3.bf16.msra.mxu0 %v808_v31  ;;  %786 = vmatprep.subr.bf16.mxu1 %v897_v1 }
 0x11c   :  { %810 = vmatprep.subr.bf16.mxu0 %v897_v1 }
 0x11e   :  { %788 = vmatpush3.bf16.msra.mxu1 %v787_v36 }
 0x11f   :  { %812 = vmatpush3.bf16.msra.mxu0 %v811_v37  ;;  %789 = vmatprep.subr.bf16.mxu1 %v897_v1 }
 0x120   :  { %813 = vmatprep.subr.bf16.mxu0 %v897_v1 }
 0x122   :  { %791 = vmatpush3.bf16.msra.mxu1 %v790_v39 }
 0x123   :  { %792 = vmatprep.subr.bf16.mxu1 %v897_v1  ;;  %815 = vmatpush3.bf16.msra.mxu0 %v814_v42 }
 0x124   :  { %816 = vmatprep.subr.bf16.mxu0 %v897_v1 }
 0x126   :  { %794 = vmatpush3.bf16.msra.mxu1 %v793_v45 }
 0x127   :  { %818 = vmatpush3.bf16.msra.mxu0 %v817_v48  ;;  %795 = vmatprep.subr.bf16.mxu1 %v897_v1 }
 0x128   :  { %819 = vmatprep.subr.bf16.mxu0 %v897_v1 }
 0x12a   :  { %797 = vmatpush3.bf16.msra.mxu1 %v796_v52 }
 0x12b   :  { %821 = vmatpush3.bf16.msra.mxu0 %v820_v56  ;;  %798 = vmatprep.subr.bf16.mxu1 %v897_v1 }
 0x12c   :  { %822 = vmatprep.subr.bf16.mxu0 %v897_v1  ;;  %v349_v1 = vsub.s32 2, %v968_v2 }
 0x12e   :  { %800 = vmatpush3.bf16.msra.mxu1 %v799_v59  ;;  %v350_v13 = vrot.slane %v971_v4, %v349_v1  ;;  %v424_v14 = vrot.slane %v973_v5, %v349_v1 }
 0x12f   :  { %824 = vmatpush3.bf16.msra.mxu0 %v823_v60 }
 0x1e4   :  { %v267_v3 = vpop.f32.mrb[0].mxu1 }
 0x1e5   :  { %v268_v6 = vadd.f32 %v267_v3, %v200_v62  ;;  %v615_v7 = vpop.f32.mrb[1].mxu1  ;;  %v342_v8 = vpop.f32.mrb[2].mxu0 }
 0x1e6   :  { %v343_v9 = vadd.f32 %v342_v8, %v275_v63  ;;  %v650_v10 = vpop.f32.mrb[3].mxu0 }
 0x1e7   :  { %836 = vtanh.f32 %v268_v6 }
 0x1e8   :  { %838 = vtanh.f32 %v343_v9 }
 0x1f1   :  { %v837_v11 = vpop.eup %836 }
 0x1f2   :  { %v839_v12 = vpop.eup %838  ;;  %684 = vmatmul.mubr.f32.vlgmr.msra.gmra.mrb[2].mxu1 %v837_v11 }
 0x1f3   :  { %719 = vmatmul.mubr.f32.vlgmr.msra.gmra.mrb[4].mxu0 %v839_v12 }
 0x2c5   :  { %v417_v15 = vpop.f32.mrb[2].mxu1 }
 0x2c6   :  { %v418_v16 = vadd.f32 %v417_v15, %v350_v13  ;;  %v685_v17 = vpop.f32.mrb[3].mxu1  ;;  %v491_v18 = vpop.f32.mrb[4].mxu0 }
 0x2c7   :  { %v492_v19 = vadd.f32 %v491_v18, %v424_v14  ;;  %v720_v20 = vpop.f32.mrb[5].mxu0 }
 0x2c8   :  { %495 = vmax.xlane.f32.xlu0 %v418_v16 }
 0x2c9   :  { %505 = vst [vmem:[%s1009_s2 + $0x8] sm:$0xff] %v492_v19 }
 0x355   :  { %v496_v21 = vpop.xlane.xlu0 %495 }
 0x356   :  { %v497_v22 = vsub.f32 %v418_v16, %v496_v21 }
 0x358   :  { %v498_v23 = vmul.f32 1.442695, %v497_v22 }
 0x35a   :  { %840 = vpow2.f32 %v498_v23 }
 0x364   :  { %v841_v2 = vpop.eup %840 }
 0x365   :  { %500 = vadd.xlane.f32.xlu0 %v841_v2 }
 0x3f2   :  { %v501_v4 = vpop.xlane.xlu0 %500 }
 0x3f3   :  { %842 = vrcp.f32 %v501_v4 }
 0x3fd   :  { %v843_v5 = vpop.eup %842 }
 0x3fe   :  { %v503_v24 = vmul.f32 %v843_v5, %v841_v2 }
 0x400   :  { %504 = vst [vmem:[%s1009_s2] sm:$0xff] %v503_v24 }
 0x401   :  { %510 = vsyncpa [#allocation3], 1 }
 0x402   :  { %511 = vsyncpa [#allocation5], 1 }

</bundles_post_ra>
